<compile_context>
chip_gen: v7x
topology: tpu7x:2x2x1
jax: 0.10.0
libtpu: 0.0.40
codegen_flags: <defaults>
</compile_context>

<pallas_src>
import functools

import jax
import jax.numpy as jnp
from jax.experimental import pallas as pl
from jax.experimental.pallas import tpu as pltpu


def _normalize_kernel(kinv_ref, p_ref, out_ref, stats_ref, *, n_valid):
    # kinv_ref:  SMEM (9,) f32  -- row-major flattened K^{-1} (scalar prefetch)
    # p_ref:     VMEM [bt, 5, Npad] -- rows 0..2 = XYZ, rows 3..4 = uv, N on lanes
    # out_ref:   VMEM [bt, 5, Npad] -- normalized correspondences, same layout
    # stats_ref: VMEM [bt, 6, 1]   -- packed per-batch [mean_xyz | 1/std_xyz]
    x = p_ref[...]                                       # [bt, 5, Npad]
    npad = x.shape[-1]
    p3 = x[:, 0:3, :]                                    # [bt, 3, Npad]
    u = x[:, 3:4, :]                                     # [bt, 1, Npad]
    v = x[:, 4:5, :]                                     # [bt, 1, Npad]

    # --- 3D normalization: mean / unbiased std over the (lane) point axis ---
    mean3 = jnp.sum(p3, axis=-1, keepdims=True) * (1.0 / n_valid)   # [bt,3,1]
    centered = p3 - mean3
    if n_valid != npad:
        lane = jax.lax.broadcasted_iota(jnp.int32, (1, 1, npad), 2)
        centered = jnp.where(lane < n_valid, centered, 0.0)  # mask padded lanes
    # torch.std default is the unbiased estimator (divide by N-1); N == 1
    # yields inf/nan exactly like torch would.
    inv_nm1 = (1.0 / (n_valid - 1)) if n_valid > 1 else float("inf")
    var = jnp.sum(centered * centered, axis=-1, keepdims=True) * inv_nm1
    scale = jax.lax.rsqrt(var)                           # EUP rsqrt, [bt,3,1]
    p3n = centered * scale                               # [bt,3,Npad]

    # --- 2D homogeneous transform (K^{-1} @ [u v 1]^T) with SMEM scalars ---
    k00 = kinv_ref[0]; k01 = kinv_ref[1]; k02 = kinv_ref[2]
    k10 = kinv_ref[3]; k11 = kinv_ref[4]; k12 = kinv_ref[5]
    p2x = k00 * u + k01 * v + k02                        # [bt, 1, Npad]
    p2y = k10 * u + k11 * v + k12                        # [bt, 1, Npad]

    # Single full-width (128-lane) store of the assembled tile.
    out_ref[...] = jnp.concatenate([p3n, p2x, p2y], axis=1)      # [bt,5,Npad]
    # Packed stats: one small output instead of two.
    stats_ref[...] = jnp.concatenate([mean3, scale], axis=1)     # [bt,6,1]


def _round_up(x, m):
    return -(-x // m) * m


def correspondence_normalizer(p3d2d_keyframe, intrinsic_matrix):
    """Pallas equivalent of CorrespondenceNormalizer.forward."""
    p = p3d2d_keyframe.astype(jnp.float32)
    B, N, C = p.shape
    assert C == 5
    k_inv = jnp.linalg.inv(intrinsic_matrix.astype(jnp.float32))   # tiny glue
    kinv_flat = k_inv.reshape(-1)                                  # (9,) f32

    # Channel-major, lane-dense layout: [B, 5, Npad] with Npad % 128 == 0.
    n_pad = _round_up(max(N, 128), 128)
    p_cm = jnp.transpose(p, (0, 2, 1))                             # [B, 5, N]
    if n_pad != N:
        p_cm = jnp.pad(p_cm, ((0, 0), (0, 0), (0, n_pad - N)))

    # Batch-chunked grid: target ~2 MiB of input per block so in+out double
    # buffers stay under ~8 MiB (fits v5e's 16 MiB scoped-VMEM default and
    # well inside v7x's 64 MiB). Keep >= 2 grid steps when B >= 2 so v7x can
    # shard the parallel axis across its two TensorCores.
    bytes_per_batch = 5 * n_pad * 4
    b_tile = max(1, (2 * 1024 * 1024) // bytes_per_batch)
    b_tile = min(b_tile, B)
    if B >= 2:
        b_tile = min(b_tile, -(-B // 2))
    b_pad = _round_up(B, b_tile)
    if b_pad != B:
        p_cm = jnp.pad(p_cm, ((0, b_pad - B), (0, 0), (0, 0)))

    grid = (b_pad // b_tile,)
    kernel = functools.partial(_normalize_kernel, n_valid=N)

    out_cm, stats = pl.pallas_call(
        kernel,
        grid_spec=pltpu.PrefetchScalarGridSpec(
            num_scalar_prefetch=1,                                  # kinv_flat
            grid=grid,
            in_specs=[
                pl.BlockSpec((b_tile, 5, n_pad), lambda b, kinv: (b, 0, 0)),
            ],
            out_specs=[
                pl.BlockSpec((b_tile, 5, n_pad), lambda b, kinv: (b, 0, 0)),
                pl.BlockSpec((b_tile, 6, 1), lambda b, kinv: (b, 0, 0)),
            ],
        ),
        out_shape=(
            jax.ShapeDtypeStruct((b_pad, 5, n_pad), jnp.float32),
            jax.ShapeDtypeStruct((b_pad, 6, 1), jnp.float32),
        ),
        compiler_params=pltpu.CompilerParams(
            dimension_semantics=("parallel",)),
    )(kinv_flat, p_cm)

    # Back to the module's [B, N, 5] convention; drop batch/point padding.
    p3d2d_n = jnp.transpose(out_cm[:B, :, :N], (0, 2, 1))

    # 4x4 normalization-matrix assembly (tiny glue, no scatter needed).
    mean3d = stats[:B, 0:3, 0]                                     # [B, 3]
    scale3d = stats[:B, 3:6, 0]                                    # [B, 3]
    eye3 = jnp.eye(3, dtype=jnp.float32)
    top_left = scale3d[:, :, None] * eye3[None, :, :]              # diag(scale)
    top_right = (-mean3d * scale3d)[:, :, None]                    # [B, 3, 1]
    top = jnp.concatenate([top_left, top_right], axis=2)           # [B, 3, 4]
    bottom = jnp.broadcast_to(
        jnp.array([[[0.0, 0.0, 0.0, 1.0]]], dtype=jnp.float32), (B, 1, 4))
    norm_mat_3d = jnp.concatenate([top, bottom], axis=1)           # [B, 4, 4]

    return {'p3d2d_n': p3d2d_n,
            'norm_mat_3d': norm_mat_3d,
            'denorm_mat_2d': k_inv}


def _reference(p3d2d, K):
    """Pure-JAX reference matching the PyTorch semantics."""
    k_inv = jnp.linalg.inv(K)
    p3 = p3d2d[:, :, :3]
    mean3 = p3.mean(axis=-2, keepdims=True)
    c = p3 - mean3
    scale = 1.0 / jnp.std(c, axis=-2, keepdims=True, ddof=1)
    p3n = c * scale
    p2 = p3d2d[:, :, 3:]
    p2h = jnp.concatenate([p2, jnp.ones_like(p2[:, :, :1])], axis=-1)
    p2n = jnp.einsum('ij,bnj->bni', k_inv, p2h)[:, :, :2]
    out = jnp.concatenate([p3n, p2n], axis=-1)
    B = p3d2d.shape[0]
    norm = jnp.broadcast_to(jnp.eye(4), (B, 4, 4))
    norm = norm.at[:, :3, :3].set(jax.vmap(jnp.diag)(scale[:, 0]))
    norm = norm.at[:, :3, 3].set((-mean3 * scale)[:, 0])
    return out, norm, k_inv


if __name__ == "__main__":
    key = jax.random.PRNGKey(0)
    k0, k1 = jax.random.split(key)

    B, N = 3, 10   # small shapes; exercises both lane and batch padding paths
    # 3D points a few meters in front of the camera, 2D points in pixels.
    p3 = jax.random.normal(k0, (B, N, 3), dtype=jnp.float32) * 2.0 + jnp.array(
        [0.0, 0.0, 5.0], dtype=jnp.float32)
    p2 = jax.random.uniform(k1, (B, N, 2), dtype=jnp.float32) * jnp.array(
        [640.0, 480.0], dtype=jnp.float32)
    p3d2d_keyframe = jnp.concatenate([p3, p2], axis=-1)            # [B, N, 5]

    # Deterministic synthetic intrinsics (the module's buffer, set via
    # set_intrinsic_matrix in the original code).
    intrinsic_matrix = jnp.array([[500.0, 0.0, 320.0],
                                  [0.0, 520.0, 240.0],
                                  [0.0, 0.0, 1.0]], dtype=jnp.float32)

    out = correspondence_normalizer(p3d2d_keyframe, intrinsic_matrix)
    jax.block_until_ready(out)

    ref_p, ref_norm, ref_kinv = _reference(p3d2d_keyframe, intrinsic_matrix)
    assert jnp.allclose(out['p3d2d_n'], ref_p, atol=1e-4, rtol=1e-4)
    assert jnp.allclose(out['norm_mat_3d'], ref_norm, atol=1e-4, rtol=1e-4)
    assert jnp.allclose(out['denorm_mat_2d'], ref_kinv, atol=1e-6, rtol=1e-6)

    print("KERNEL_OK")
</pallas_src>

<mosaic_0001>
module attributes {stable_mosaic.version = 11 : i64} {
  func.func @_normalize_kernel(%arg0: i32, %arg1: memref<9xf32, #tpu.memory_space<smem>>, %arg2: memref<2x5x128xf32, #tpu.memory_space<vmem>>, %arg3: memref<2x5x128xf32, #tpu.memory_space<vmem>>, %arg4: memref<2x6x1xf32, #tpu.memory_space<vmem>>) attributes {dimension_semantics = [#tpu.dimension_semantics<parallel>], iteration_bounds = array<i64: 2>, scalar_prefetch = 1 : i64, scratch_operands = 0 : i64, tpu.core_type = #tpu.core_type<tc>, window_params = [{transform_indices = @transform_0, window_bounds = array<i64: 2, 5, 128>}, {transform_indices = @transform_1, window_bounds = array<i64: 2, 5, 128>}, {transform_indices = @transform_2, window_bounds = array<i64: 2, 6, 1>}]} {
    %c0 = arith.constant 0 : index
    %c0_0 = arith.constant 0 : index
    %c0_1 = arith.constant 0 : index
    %0 = vector.load %arg2[%c0, %c0_0, %c0_1] : memref<2x5x128xf32, #tpu.memory_space<vmem>>, vector<2x5x128xf32>
    %1 = vector.extract_strided_slice %0 {offsets = [0, 0, 0], sizes = [2, 3, 128], strides = [1, 1, 1]} : vector<2x5x128xf32> to vector<2x3x128xf32>
    %2 = vector.extract_strided_slice %0 {offsets = [0, 3, 0], sizes = [2, 1, 128], strides = [1, 1, 1]} : vector<2x5x128xf32> to vector<2x1x128xf32>
    %3 = vector.extract_strided_slice %0 {offsets = [0, 4, 0], sizes = [2, 1, 128], strides = [1, 1, 1]} : vector<2x5x128xf32> to vector<2x1x128xf32>
    %cst = arith.constant dense<0.000000e+00> : vector<2x3xf32>
    %4 = vector.multi_reduction <add>, %1, %cst [2] : vector<2x3x128xf32> to vector<2x3xf32>
    %5 = vector.shape_cast %4 : vector<2x3xf32> to vector<2x3x1xf32>
    %cst_2 = arith.constant 1.000000e-01 : f32
    %6 = vector.broadcast %cst_2 : f32 to vector<2x3x1xf32>
    %7 = arith.mulf %5, %6 : vector<2x3x1xf32>
    %8 = vector.broadcast %7 : vector<2x3x1xf32> to vector<2x3x128xf32>
    %9 = arith.subf %1, %8 : vector<2x3x128xf32>
    %10 = tpu.iota {dimensions = array<i32: 2>} : vector<1x1x128xi32>
    %c10_i32 = arith.constant 10 : i32
    %11 = vector.broadcast %c10_i32 : i32 to vector<1x1x128xi32>
    %12 = arith.cmpi slt, %10, %11 : vector<1x1x128xi32>
    %cst_3 = arith.constant 0.000000e+00 : f32
    %13 = vector.shape_cast %12 : vector<1x1x128xi1> to vector<1x1x128xi1>
    %14 = vector.broadcast %13 : vector<1x1x128xi1> to vector<2x3x128xi1>
    %15 = vector.broadcast %cst_3 : f32 to vector<2x3x128xf32>
    %16 = arith.select %14, %9, %15 : vector<2x3x128xi1>, vector<2x3x128xf32>
    %17 = arith.mulf %16, %16 : vector<2x3x128xf32>
    %cst_4 = arith.constant dense<0.000000e+00> : vector<2x3xf32>
    %18 = vector.multi_reduction <add>, %17, %cst_4 [2] : vector<2x3x128xf32> to vector<2x3xf32>
    %19 = vector.shape_cast %18 : vector<2x3xf32> to vector<2x3x1xf32>
    %cst_5 = arith.constant 0.111111112 : f32
    %20 = vector.broadcast %cst_5 : f32 to vector<2x3x1xf32>
    %21 = arith.mulf %19, %20 : vector<2x3x1xf32>
    %22 = math.rsqrt %21 : vector<2x3x1xf32>
    %23 = vector.broadcast %22 : vector<2x3x1xf32> to vector<2x3x128xf32>
    %24 = arith.mulf %16, %23 : vector<2x3x128xf32>
    %c0_6 = arith.constant 0 : index
    %25 = memref.load %arg1[%c0_6] : memref<9xf32, #tpu.memory_space<smem>>
    %c1 = arith.constant 1 : index
    %26 = memref.load %arg1[%c1] : memref<9xf32, #tpu.memory_space<smem>>
    %c2 = arith.constant 2 : index
    %27 = memref.load %arg1[%c2] : memref<9xf32, #tpu.memory_space<smem>>
    %c3 = arith.constant 3 : index
    %28 = memref.load %arg1[%c3] : memref<9xf32, #tpu.memory_space<smem>>
    %c4 = arith.constant 4 : index
    %29 = memref.load %arg1[%c4] : memref<9xf32, #tpu.memory_space<smem>>
    %c5 = arith.constant 5 : index
    %30 = memref.load %arg1[%c5] : memref<9xf32, #tpu.memory_space<smem>>
    %31 = vector.broadcast %25 : f32 to vector<2x1x128xf32>
    %32 = arith.mulf %31, %2 : vector<2x1x128xf32>
    %33 = vector.broadcast %26 : f32 to vector<2x1x128xf32>
    %34 = arith.mulf %33, %3 : vector<2x1x128xf32>
    %35 = arith.addf %32, %34 : vector<2x1x128xf32>
    %36 = vector.broadcast %27 : f32 to vector<2x1x128xf32>
    %37 = arith.addf %35, %36 : vector<2x1x128xf32>
    %38 = vector.broadcast %28 : f32 to vector<2x1x128xf32>
    %39 = arith.mulf %38, %2 : vector<2x1x128xf32>
    %40 = vector.broadcast %29 : f32 to vector<2x1x128xf32>
    %41 = arith.mulf %40, %3 : vector<2x1x128xf32>
    %42 = arith.addf %39, %41 : vector<2x1x128xf32>
    %43 = vector.broadcast %30 : f32 to vector<2x1x128xf32>
    %44 = arith.addf %42, %43 : vector<2x1x128xf32>
    %45 = tpu.concatenate %24, %37, %44 in 1 : vector<2x3x128xf32>, vector<2x1x128xf32>, vector<2x1x128xf32> -> vector<2x5x128xf32>
    %c0_7 = arith.constant 0 : index
    %c0_8 = arith.constant 0 : index
    %c0_9 = arith.constant 0 : index
    %46 = vector.load %arg3[%c0_7, %c0_8, %c0_9] : memref<2x5x128xf32, #tpu.memory_space<vmem>>, vector<2x5x128xf32>
    tpu.vector_store %arg3[%c0_7, %c0_8, %c0_9], %45 {strides = array<i32>} : memref<2x5x128xf32, #tpu.memory_space<vmem>>, vector<2x5x128xf32>,
    %47 = tpu.concatenate %7, %22 in 1 : vector<2x3x1xf32>, vector<2x3x1xf32> -> vector<2x6x1xf32>
    %c0_10 = arith.constant 0 : index
    %c0_11 = arith.constant 0 : index
    %c0_12 = arith.constant 0 : index
    %48 = vector.load %arg4[%c0_10, %c0_11, %c0_12] : memref<2x6x1xf32, #tpu.memory_space<vmem>>, vector<2x6x1xf32>
    tpu.vector_store %arg4[%c0_10, %c0_11, %c0_12], %47 {strides = array<i32>} : memref<2x6x1xf32, #tpu.memory_space<vmem>>, vector<2x6x1xf32>,
    return
  }
  func.func @transform_0(%arg0: i32, %arg1: memref<9xf32, #tpu.memory_space<smem>>) -> (i32, i32, i32) {
    %c0_i32 = arith.constant 0 : i32
    %c0_i32_0 = arith.constant 0 : i32
    %c0_i32_1 = arith.constant 0 : i32
    return %arg0, %c0_i32, %c0_i32_0 : i32, i32, i32
  }
  func.func @transform_1(%arg0: i32, %arg1: memref<9xf32, #tpu.memory_space<smem>>) -> (i32, i32, i32) {
    %c0_i32 = arith.constant 0 : i32
    %c0_i32_0 = arith.constant 0 : i32
    %c0_i32_1 = arith.constant 0 : i32
    return %arg0, %c0_i32, %c0_i32_0 : i32, i32, i32
  }
  func.func @transform_2(%arg0: i32, %arg1: memref<9xf32, #tpu.memory_space<smem>>) -> (i32, i32, i32) {
    %c0_i32 = arith.constant 0 : i32
    %c0_i32_0 = arith.constant 0 : i32
    %c0_i32_1 = arith.constant 0 : i32
    return %arg0, %c0_i32, %c0_i32_0 : i32, i32, i32
  }
}

</mosaic_0001>

<bundles_post_ra>
// kernel: tpu_custom_call.1
= control target key start
LH: loop header
LB: loop body
LE: loop exit
PB: predicated region body
PF: predicated region fallthrough
CT: control target
= control target key end

     0   :  { %s480_s0 = inlined_call_operand.vmem [shape: f32[9], index: 0, kind: input, shape index: {}]   ;;  %s481_s1 = inlined_call_operand.vmem [shape: f32[4,5,128], index: 1, kind: input, shape index: {}]   ;;  %s482_s2 = inlined_call_operand.vmem [shape: f32[4,5,128], index: 2, kind: output, shape index: {0}]   ;;  %s483_s3 = inlined_call_operand.vmem [shape: f32[4,6,1], index: 3, kind: output, shape index: {1}]  }
   0x1   :  { %s9_s14 = sshll.u32 %s480_s0, 4  ;;  %s10_s14 = int_to_ptr.vmem [resolvable:$true] %s9_s14 }
   0x2   :  { %s387_s15 = scalar_lea.vmem %s10_s14, 16  ;;  %p392_p1 = scmp.lt.s32.totalorder %s10_s14, %s10_s14 }
   0x3   :  { %p388_p0 = scmp.ne.s32.totalorder %s10_s14, %s387_s15  ;;  %p393_p2 = scmp.lt.s32.totalorder %s387_s15, %s387_s15 }
   0x5   :  { %p394_p3 = por %p393_p2, %p392_p1 }
   0x7   :  { %p395_p4 = pnand %p394_p3, %p388_p0 }
   0x9   :  { %398 = shalt.err (!%p395_p4)  }
   0xa   :  { %s409_s16 = smov [#allocation3]  }
   0xb   :  { %12 = dma.vmem_to_smem %s10_s14, 16, %s409_s16, [#allocation2] }
   0xc   :  { %403 = dma.done.wait [#allocation2], 16 }
   0xd   :  { %404 = vsyncadd [#allocation2], 4294967280 }
   0xe   :  { %14 = sfence }
   0xf   :  { %s433_s17 = smov 0  }
  0x10 LB: > { %s356_s0 = sadd.s32 4294967295, %s407_s17   ;;  %p360_p5 = scmp.ge.s32.totalorder %s407_s17, 1  ;;  %s407_s17 = sphi %s433_s17, %s20_s17  }
  0x11   : > { %p123_p6 = scmp.lt.s32.totalorder %s407_s17, 3 }
  0x13   : > { %p124_p7 = pnand %p360_p5, %p123_p6 }
  0x14   : > { %s361_s18 = sshll.u32 (!%p124_p7), %s356_s0, 1  ;;  %vm170_vm0 = vcmask (!%p124_p7), 1042432   ;;  %v181_v4 = vlaneseq (!%p124_p7)  ;;  %s370_s23 = sld [smem:[#allocation3 + $0x4]] (!%p124_p7)  ;;  %vm250_vm2 = vcmask (!%p124_p7), 1043456   ;;  %vm263_vm3 = vcmask (!%p124_p7), 5120  }
  0x15   : > { %127 = sbr.rel (%p124_p7) target bundleno = 347 (0x15b), region = 24  ;;  %p151_p8 = scmp.lt.s32.totalorder (!%p124_p7), %s361_s18, 3 }
  0x16   : > { %v182_v5 = vand.u32 (!%p124_p7), 127, %v181_v4  ;;  %s367_s24 = sld [smem:[#allocation3 + $0x1]] (!%p124_p7)  ;;  %s369_s25 = sld [smem:[#allocation3 + $0x3]] (!%p124_p7) }
  0x17   : > { %s202_s26 = sld [smem:[#allocation3]] (!%p124_p7)  ;;  %s454_s27 = sld [smem:[#allocation3 + $0x5]] (!%p124_p7) }
  0x18   : > { %vm183_vm1 = vcmp.lt.s32.totalorder (!%p124_p7), %v182_v5, 10  ;;  %s456_s28 = sld [smem:[#allocation3 + $0x2]] (!%p124_p7) }
  0x1a   : > { %v228_v18 = vstv (!%p124_p7), %s370_s23 }
  0x1c   : > { %s485_s18 = smov (!%p151_p8, %s361_s18), 3  ;;  %v211_v19 = vstv %s367_s24  ;;  %v225_v21 = vstv %s369_s25 }
  0x1d   : > { %s441_s19 = sshll.u32 %s485_s18, 3  ;;  %v208_v22 = vstv %s202_s26  ;;  %v239_v37 = vstv %s454_s27 }
  0x1e   : > { %s154_s22 = scalar_lea.vmem %s481_s1, %s441_s19  ;;  %v222_v43 = vstv %s456_s28  ;;  %s166_s4 = scalar_lea.vmem %s483_s3, %s441_s19 }
  0x1f   : > { %v168_v0 = vld [vmem:[%s154_s22] sm:$0x1f]  ;;  %v169_v1 = vld [vmem:[%s154_s22 + $0x8] sm:$0x1f]  ;;  %s160_s7 = scalar_lea.vmem %s482_s2, %s441_s19 }
  0x20   : > { %v171_v2 = vsel %vm170_vm0, %v168_v0, 0.0  ;;  %v174_v3 = vsel %vm170_vm0, %v169_v1, 0.0  ;;  %v229_v20 = vmul.f32 %v228_v18, %v168_v0  ;;  %v212_v23 = vmul.f32 %v211_v19, %v168_v0 }
  0x21   : > { %172 = vadd.xlane.f32.xlu0 %v171_v2  ;;  %v226_v25 = vmul.f32 %v225_v21, %v168_v0  ;;  %v230_v27 = vmul.f32 %v228_v18, %v169_v1  ;;  %v209_v29 = vmul.f32 %v208_v22, %v168_v0  ;;  %v213_v31 = vmul.f32 %v211_v19, %v169_v1 }
  0x22   : > { %v233_v26 = vrot.slane %v229_v20, 1  ;;  %v216_v30 = vrot.slane %v212_v23, 1  ;;  %v227_v34 = vmul.f32 %v225_v21, %v169_v1  ;;  %v210_v39 = vmul.f32 %v208_v22, %v169_v1 }
  0x23   : > { %v234_v35 = vrot.slane %v230_v27, 1  ;;  %v217_v40 = vrot.slane %v213_v31, 1 }
  0x24   : > { %v237_v33 = vadd.f32 %v233_v26, %v226_v25  ;;  %v220_v38 = vadd.f32 %v216_v30, %v209_v29 }
  0x25   : > { %175 = vadd.xlane.f32.xlu0 %v174_v3  ;;  %v238_v42 = vadd.f32 %v234_v35, %v227_v34  ;;  %v221_v44 = vadd.f32 %v217_v40, %v210_v39 }
  0x26   : > { %v240_v41 = vadd.f32 %v239_v37, %v237_v33  ;;  %v223_v45 = vadd.f32 %v222_v43, %v220_v38 }
  0x27   : > { %v241_v48 = vadd.f32 %v239_v37, %v238_v42  ;;  %v224_v53 = vadd.f32 %v222_v43, %v221_v44 }
  0x28   : > { %v244_v47 = vrot.slane %v240_v41, 7 }
  0x29   : > { %v245_v56 = vrot.slane %v241_v48, 7 }
  0xae   : > { %v173_v6 = vpop.xlane.xlu0 %172 }
  0xaf   : > { %v177_v7 = vmul.f32 0.1, %v173_v6 }
  0xb1   : > { %v179_v8 = vsub.f32 %v168_v0, %v177_v7 }
  0xb2   : > { %v176_v9 = vpop.xlane.xlu0 %175 }
  0xb3   : > { %v449_v10 = vmul.f32 0.1, %v176_v9  ;;  %v186_v11 = vsel %vm183_vm1, %v179_v8, 0.0 }
  0xb4   : > { %v188_v12 = vmul.f32 %v186_v11, %v186_v11 }
  0xb5   : > { %v180_v13 = vsub.f32 %v169_v1, %v449_v10 }
  0xb6   : > { %v190_v14 = vsel %vm170_vm0, %v188_v12, 0.0 }
  0xb7   : > { %191 = vadd.xlane.f32.xlu1 %v190_v14  ;;  %v187_v15 = vsel %vm183_vm1, %v180_v13, 0.0 }
  0xb8   : > { %v189_v16 = vmul.f32 %v187_v15, %v187_v15 }
  0xba   : > { %v193_v17 = vsel %vm170_vm0, %v189_v16, 0.0 }
  0xbb   : > { %194 = vadd.xlane.f32.xlu1 %v193_v17 }
 0x144   : > { %v192_v24 = vpop.xlane.xlu1 %191 }
 0x145   : > { %v196_v28 = vmul.f32 0.11111111, %v192_v24 }
 0x147   : > { %383 = vrsqrt.f32 %v196_v28 }
 0x148   : > { %v195_v32 = vpop.xlane.xlu1 %194 }
 0x149   : > { %v197_v36 = vmul.f32 0.11111111, %v195_v32 }
 0x14b   : > { %385 = vrsqrt.f32 %v197_v36 }
 0x151   : > { %v384_v46 = vpop.eup %383 }
 0x152   : > { %v200_v49 = vmul.f32 %v384_v46, %v186_v11  ;;  %v257_v50 = vrot.slane %v384_v46, 5 }
 0x154   : > { %v248_v51 = vsel %vm170_vm0, %v200_v49, %v223_v45  ;;  %v261_v52 = vsel %vm170_vm0, %v177_v7, %v257_v50 }
 0x155   : > { %v386_v54 = vpop.eup %385  ;;  %v251_v55 = vsel %vm250_vm2, %v248_v51, %v244_v47  ;;  %264 = vst.msk [vmem:[%s166_s4] sm:$0x3f] %vm263_vm3, %v261_v52 }
 0x156   : > { %253 = vst [vmem:[%s160_s7] sm:$0x1f] %v251_v55  ;;  %v201_v57 = vmul.f32 %v386_v54, %v187_v15  ;;  %v258_v58 = vrot.slane %v386_v54, 5 }
 0x158   : > { %v249_v59 = vsel %vm170_vm0, %v201_v57, %v224_v53  ;;  %v262_v60 = vsel %vm170_vm0, %v449_v10, %v258_v58 }
 0x159   : > { %v252_v61 = vsel %vm250_vm2, %v249_v59, %v245_v56  ;;  %265 = vst.msk [vmem:[%s166_s4 + $0x8] sm:$0x3f] %vm263_vm3, %v262_v60 }
 0x15a   : > { %254 = vst [vmem:[%s160_s7 + $0x8] sm:$0x1f] %v252_v61 }
 0x15b PF: > { %s20_s17 = sadd.s32 1, %s407_s17  }
 0x15c   : > { %p17_p9 = scmp.ge.s32.totalorder %s20_s17, 4  }
 0x15e   :  { %19 = sbr.rel (!%p17_p9) target bundleno = 16 (0x10), region = 66 }

</bundles_post_ra>
